<compile_context>
chip_gen: v7x
topology: tpu7x:2x2x1
jax: 0.10.0
libtpu: 0.0.40
codegen_flags: <defaults>
</compile_context>

<pallas_src>
import functools

import jax
import jax.numpy as jnp
from jax.experimental import pallas as pl
from jax.experimental.pallas import tpu as pltpu


def _round_up(v, m):
    return (v + m - 1) // m * m


def _tpu_generation():
    try:
        kind = jax.devices()[0].device_kind.lower()
    except Exception:
        return 0
    for g in (7, 6, 5, 4, 3):
        if str(g) in kind:
            return g
    return 0


_GEN = _tpu_generation()

# v5e/v6e have 128 MiB physical VMEM -> allow a 64 MiB scoped budget.
# v7x has only 64 MiB physical (and unknown gens get the safe default): 32 MiB.
_VMEM_LIMIT = (64 * 1024 * 1024) if _GEN in (5, 6) else (32 * 1024 * 1024)
# v5e: 128-wide output tiles (single vst slot, smaller f32 epilogue);
# v6e/v7x: 256-wide tiles feed the 2x256 MXU.
_TN_MAX = 128 if _GEN == 5 else 256
_TM_MAX = 256            # M-tile cap (multiple of 16 for bf16 sublane packing)
_FULL_K_MAX = 8192       # keep the whole K dim in one block up to this size

LAYER_CFG = ((64, 3, 1), (128, 8, 2), (256, 36, 2), (512, 3, 2))  # ResNet-152
_NUM_CLASSES = 12


# ----------------------------------------------------------------------------
# Pallas kernel: matmul with fused int8 dequant + BN scale/bias (+res) (+ReLU)
# ----------------------------------------------------------------------------
def _mm_kernel(*refs, relu, has_res, single_k):
    if single_k:
        # Whole K in one block: the dot accumulates in f32 internally, the
        # epilogue runs on the f32 result before the bf16 store; no scratch.
        if has_res:
            x_ref, w_ref, s_ref, b_ref, r_ref, o_ref = refs
        else:
            x_ref, w_ref, s_ref, b_ref, o_ref = refs
            r_ref = None
        w = w_ref[...]
        if w.dtype != jnp.bfloat16:        # int8 weight: dequant in VMEM (VPU
            w = w.astype(jnp.bfloat16)     # has slack in this DMA-bound regime)
        acc = jnp.dot(x_ref[...], w, preferred_element_type=jnp.float32)
        y = acc * s_ref[...] + b_ref[...]
        if has_res:
            y = y + r_ref[...].astype(jnp.float32)
        if relu:
            y = jnp.maximum(y, 0.0)
        o_ref[...] = y.astype(o_ref.dtype)
        return

    # General K-tiled fallback (unused at ResNet-152 shapes): f32 accumulator.
    if has_res:
        x_ref, w_ref, s_ref, b_ref, r_ref, o_ref, acc_ref = refs
    else:
        x_ref, w_ref, s_ref, b_ref, o_ref, acc_ref = refs
        r_ref = None

    k = pl.program_id(2)

    @pl.when(k == 0)
    def _():
        acc_ref[...] = jnp.zeros_like(acc_ref)

    w = w_ref[...]
    if w.dtype != jnp.bfloat16:
        w = w.astype(jnp.bfloat16)
    acc_ref[...] += jnp.dot(x_ref[...], w, preferred_element_type=jnp.float32)

    @pl.when(k == pl.num_programs(2) - 1)
    def _():
        y = acc_ref[...] * s_ref[...] + b_ref[...]
        if has_res:
            y = y + r_ref[...].astype(jnp.float32)
        if relu:
            y = jnp.maximum(y, 0.0)
        o_ref[...] = y.astype(o_ref.dtype)


def fused_matmul(x, w, scale, bias, residual=None, relu=True,
                 out_dtype=jnp.bfloat16):
    """y = act((x @ dequant(w)) * scale + bias [+ residual]).

    x: (M, K) activations (cast to bf16); w: (K, N) int8 (conv) or bf16
    weights; scale/bias are per-output-channel (BN + int8 dequant folded).
    bf16 operands on the MXU with f32 accumulation.
    """
    M, K = x.shape
    Kw, N = w.shape
    assert Kw == K

    # M tiling: pick TM to minimize padding (real grid axis, bounds VMEM).
    Mp0 = _round_up(M, 16)
    num_m = -(-Mp0 // _TM_MAX)
    TM = _round_up(-(-Mp0 // num_m), 16)
    Mp = TM * num_m

    # K: one full-extent block when it fits (no padding; x index map ignores j
    # so x tiles are re-used across output-N tiles instead of re-streamed).
    # TODO(synk): for large-M deployments swap to a weight-resident loop order
    # (j outer) when weight bytes > x-tile bytes; irrelevant at M <= 512 here.
    if K <= _FULL_K_MAX:
        TK, Kp = K, K
    else:
        TK = 512
        Kp = _round_up(K, TK)
    single_k = (Kp == TK)

    # N tiling: never narrower than 128 lanes (lane-dense stores); 256 where
    # the generation and the layer allow it.
    if N % 256 == 0 and _TN_MAX >= 256:
        TN, Np = 256, N
    elif N % 128 == 0:
        TN, Np = 128, N
    else:
        Np = _round_up(N, 128)
        TN = 128

    xb = x.astype(jnp.bfloat16)
    if (Mp, Kp) != (M, K):
        xb = jnp.pad(xb, ((0, Mp - M), (0, Kp - K)))
    wp = w
    sp = scale.astype(jnp.float32).reshape(1, N)
    bp = bias.astype(jnp.float32).reshape(1, N)
    if (Kp, Np) != (K, N):
        wp = jnp.pad(wp, ((0, Kp - K), (0, Np - N)))
        sp = jnp.pad(sp, ((0, 0), (0, Np - N)))
        bp = jnp.pad(bp, ((0, 0), (0, Np - N)))

    has_res = residual is not None
    inputs = [xb, wp, sp, bp]
    in_specs = [
        pl.BlockSpec((TM, TK), lambda i, j, k: (i, k)),   # x (constant in j)
        pl.BlockSpec((TK, TN), lambda i, j, k: (k, j)),   # weight (int8/bf16)
        pl.BlockSpec((1, TN), lambda i, j, k: (0, j)),    # folded scale
        pl.BlockSpec((1, TN), lambda i, j, k: (0, j)),    # folded bias
    ]
    if has_res:
        rb = residual.astype(jnp.bfloat16)
        if (Mp, Np) != (M, N):
            rb = jnp.pad(rb, ((0, Mp - M), (0, Np - N)))
        inputs.append(rb)
        in_specs.append(pl.BlockSpec((TM, TN), lambda i, j, k: (i, j)))

    scratch = [] if single_k else [pltpu.VMEM((TM, TN), jnp.float32)]
    grid = (Mp // TM, Np // TN, Kp // TK)

    out = pl.pallas_call(
        functools.partial(_mm_kernel, relu=relu, has_res=has_res,
                          single_k=single_k),
        out_shape=jax.ShapeDtypeStruct((Mp, Np), out_dtype),
        grid_spec=pltpu.PrefetchScalarGridSpec(
            num_scalar_prefetch=0,
            grid=grid,
            in_specs=in_specs,
            out_specs=pl.BlockSpec((TM, TN), lambda i, j, k: (i, j)),
            scratch_shapes=scratch,
        ),
        compiler_params=pltpu.CompilerParams(
            dimension_semantics=("parallel", "parallel", "arbitrary"),
            vmem_limit_bytes=_VMEM_LIMIT),
    )(*inputs)

    if (Mp, Np) != (M, N):
        out = out[:M, :N]
    return out


# ----------------------------------------------------------------------------
# Pallas kernel: fused avg-pool feed + 3-layer FC head
# ----------------------------------------------------------------------------
def _fc_head_kernel(x_ref, w1_ref, b1_ref, w2_ref, b2_ref, w3_ref, b3_ref,
                    o_ref):
    h = jnp.dot(x_ref[...], w1_ref[...], preferred_element_type=jnp.float32)
    h = jnp.maximum(h + b1_ref[...], 0.0)
    h = jnp.dot(h.astype(jnp.bfloat16), w2_ref[...],
                preferred_element_type=jnp.float32)
    h = jnp.maximum(h + b2_ref[...], 0.0)
    h = jnp.dot(h.astype(jnp.bfloat16), w3_ref[...],
                preferred_element_type=jnp.float32)
    o_ref[...] = (h + b3_ref[...]).astype(o_ref.dtype)


@jax.jit
def fc_head(x_nhwc, fc):
    """Adaptive avg-pool (1,1) + Linear-ReLU-Linear-ReLU-Linear in one call.

    Weights stay resident in VMEM; intermediate activations never leave VMEM
    between the three Linear layers.  The 12-class output is padded to 128
    lanes inside the kernel for a lane-dense store and sliced afterwards.
    """
    feats = jnp.mean(x_nhwc.astype(jnp.float32), axis=(1, 2))
    M, K = feats.shape
    Mp = _round_up(M, 16)
    xb = jnp.pad(feats.astype(jnp.bfloat16), ((0, Mp - M), (0, 0)))
    w1, b1 = fc["w1"], fc["b1"]
    w2, b2 = fc["w2"], fc["b2"]
    w3, b3 = fc["w3"], fc["b3"]
    H1, H2, NOp = w1.shape[1], w2.shape[1], w3.shape[1]

    def full(shape):
        return pl.BlockSpec(shape, lambda i: (0,) * len(shape))

    out = pl.pallas_call(
        _fc_head_kernel,
        out_shape=jax.ShapeDtypeStruct((Mp, NOp), jnp.float32),
        grid_spec=pltpu.PrefetchScalarGridSpec(
            num_scalar_prefetch=0,
            grid=(1,),
            in_specs=[full((Mp, K)),
                      full((K, H1)), full((1, H1)),
                      full((H1, H2)), full((1, H2)),
                      full((H2, NOp)), full((1, NOp))],
            out_specs=full((Mp, NOp)),
        ),
        compiler_params=pltpu.CompilerParams(
            dimension_semantics=("arbitrary",),
            vmem_limit_bytes=_VMEM_LIMIT),
    )(xb, w1, b1, w2, b2, w3, b3)
    return out[:M, :_NUM_CLASSES]


# ----------------------------------------------------------------------------
# Conv / pooling built on the Pallas matmul
# ----------------------------------------------------------------------------
def apply_conv(x, cp, kh, kw, stride, pad, relu=True, residual=None):
    """x: NHWC bf16.  cp: {"w": int8 (KH*KW*C, OC), "scale", "bias"}."""
    N, H, W, C = x.shape
    OC = cp["scale"].shape[0]
    OH = (H + 2 * pad - kh) // stride + 1
    OW = (W + 2 * pad - kw) // stride + 1

    if kh == 1 and kw == 1 and pad == 0:
        # 1x1 conv: no patch extraction at all (strided slice + reshape only).
        xs = x[:, ::stride, ::stride, :] if stride > 1 else x
        xm = xs.reshape(N * OH * OW, C)
    else:
        # TODO(synk): the KxK convs still materialize a KH*KW-expanded im2col
        # matrix via XLA (pad + shifted slices + concat); fusing the tap loop
        # into the kernel (element-offset windows of the padded NHWC activation
        # accumulated in the f32 scratch) is the remaining step and matters
        # most at larger input resolutions.
        xp = jnp.pad(x, ((0, 0), (pad, pad), (pad, pad), (0, 0)))
        cols = []
        for ih in range(kh):
            for iw in range(kw):
                cols.append(xp[:, ih:ih + (OH - 1) * stride + 1:stride,
                                  iw:iw + (OW - 1) * stride + 1:stride, :])
        xm = jnp.concatenate(cols, axis=-1).reshape(N * OH * OW, kh * kw * C)

    rm = residual.reshape(N * OH * OW, OC) if residual is not None else None
    ym = fused_matmul(xm, cp["w"], cp["scale"], cp["bias"],
                      residual=rm, relu=relu, out_dtype=jnp.bfloat16)
    return ym.reshape(N, OH, OW, OC)


def maxpool_3x3_s2_p1(x):
    # TODO(synk): pooling kept as plain-JAX reduce_window glue (negligible vs
    # the conv matmuls).  Same-dtype -inf init keeps the map in bf16.
    neg_inf = jnp.asarray(-jnp.inf, dtype=x.dtype)
    return jax.lax.reduce_window(
        x, neg_inf, jax.lax.max,
        window_dimensions=(1, 3, 3, 1),
        window_strides=(1, 2, 2, 1),
        padding=((0, 0), (1, 1), (1, 1), (0, 0)))


# ----------------------------------------------------------------------------
# ResNet-152 parameters (deterministic synthetic init) + one-time prep
# ----------------------------------------------------------------------------
class _KeyGen:
    def __init__(self, key):
        self.key = key

    def __call__(self):
        self.key, sub = jax.random.split(self.key)
        return sub


def _conv_weight(kg, oc, ic, kh, kw):
    fan_in = ic * kh * kw
    w = jax.random.normal(kg(), (oc, ic, kh, kw), jnp.float32)
    return (w / jnp.sqrt(float(fan_in))).astype(jnp.float32)


def _bn_scale_bias(kg, c, eps=1e-5):
    gamma = jax.random.uniform(kg(), (c,), jnp.float32, 0.5, 1.5)
    beta = jax.random.normal(kg(), (c,), jnp.float32) * 0.1
    rmean = jax.random.normal(kg(), (c,), jnp.float32) * 0.1
    rvar = jax.random.uniform(kg(), (c,), jnp.float32, 0.5, 1.5)
    scale = gamma / jnp.sqrt(rvar + eps)
    bias = beta - rmean * scale
    return scale, bias


def _linear(kg, in_f, out_f):
    w = jax.random.normal(kg(), (out_f, in_f), jnp.float32) / jnp.sqrt(float(in_f))
    b = jax.random.normal(kg(), (out_f,), jnp.float32) * 0.01
    return w.astype(jnp.float32), b


def init_params(key):
    """Synthetic ResNet-152 weights in PyTorch layout (pretrained checkpoint
    replaced by deterministic init)."""
    kg = _KeyGen(key)
    params = {"conv1": _conv_weight(kg, 64, 3, 7, 7),
              "bn1": _bn_scale_bias(kg, 64)}
    inplanes = 64
    layers = []
    for planes, blocks, stride in LAYER_CFG:            # [3, 8, 36, 3]
        block_params = []
        for b in range(blocks):
            s = stride if b == 0 else 1
            needs_ds = (b == 0) and (s != 1 or inplanes != planes * 4)
            bp = {
                "conv1": _conv_weight(kg, planes, inplanes, 1, 1),
                "bn1": _bn_scale_bias(kg, planes),
                "conv2": _conv_weight(kg, planes, planes, 3, 3),
                "bn2": _bn_scale_bias(kg, planes),
                "conv3": _conv_weight(kg, planes * 4, planes, 1, 1),
                "bn3": _bn_scale_bias(kg, planes * 4),
            }
            if needs_ds:
                bp["ds_conv"] = _conv_weight(kg, planes * 4, inplanes, 1, 1)
                bp["ds_bn"] = _bn_scale_bias(kg, planes * 4)
            block_params.append(bp)
            inplanes = planes * 4
        layers.append(block_params)
    params["layers"] = layers
    # fc head: Linear(2048,1024) ReLU Linear(1024,1024) ReLU Linear(1024,12)
    params["fc"] = [_linear(kg, 2048, 1024), _linear(kg, 1024, 1024),
                    _linear(kg, 1024, _NUM_CLASSES)]
    return params


def _quantize_conv(w_oihw, bn):
    """OIHW conv weight -> int8 (KH*KW*IC, OC) matmul weight + folded scale/bias.

    Per-output-channel symmetric int8 quantization; the dequant factor is
    folded into the eval-mode BatchNorm scale so the kernel epilogue stays a
    single scale+bias.  int8 storage halves weight-HBM traffic on every
    generation; the kernel dequantizes to bf16 in VMEM before the MXU dot, so
    it never relies on an integer (v5e/v6e) or fp8 (v7x) MXU path.
    """
    oc, ic, kh, kw = w_oihw.shape
    wm = jnp.transpose(w_oihw, (2, 3, 1, 0)).reshape(kh * kw * ic, oc)
    wm = wm.astype(jnp.float32)
    amax = jnp.maximum(jnp.max(jnp.abs(wm), axis=0), 1e-8)
    wq = jnp.clip(jnp.round(wm * (127.0 / amax)), -127.0, 127.0).astype(jnp.int8)
    scale, bias = bn
    return {"w": wq,
            "scale": (scale * amax / 127.0).astype(jnp.float32),
            "bias": bias.astype(jnp.float32)}


def prepare_params(params):
    """One-time weight prep (layout, int8 quantization, BN folding)."""
    prepared = {"stem": _quantize_conv(params["conv1"], params["bn1"])}
    layers = []
    for blocks in params["layers"]:
        plist = []
        for bp in blocks:
            entry = {"conv1": _quantize_conv(bp["conv1"], bp["bn1"]),
                     "conv2": _quantize_conv(bp["conv2"], bp["bn2"]),
                     "conv3": _quantize_conv(bp["conv3"], bp["bn3"])}
            if "ds_conv" in bp:
                entry["ds"] = _quantize_conv(bp["ds_conv"], bp["ds_bn"])
            plist.append(entry)
        layers.append(plist)
    prepared["layers"] = layers
    (w1, b1), (w2, b2), (w3, b3) = params["fc"]
    no_p = _round_up(_NUM_CLASSES, 128)         # lane-dense head output
    w3p = jnp.pad(w3.T, ((0, 0), (0, no_p - _NUM_CLASSES)))
    b3p = jnp.pad(b3.reshape(1, -1), ((0, 0), (0, no_p - _NUM_CLASSES)))
    prepared["fc"] = {
        "w1": w1.T.astype(jnp.bfloat16),
        "b1": b1.reshape(1, -1).astype(jnp.float32),
        "w2": w2.T.astype(jnp.bfloat16),
        "b2": b2.reshape(1, -1).astype(jnp.float32),
        "w3": w3p.astype(jnp.bfloat16),
        "b3": b3p.astype(jnp.float32),
    }
    return prepared


# ----------------------------------------------------------------------------
# Forward pass
# ----------------------------------------------------------------------------
@jax.jit
def stem_forward(images_nchw, stem_p):
    """NCHW -> NHWC, 7x7/s2 conv (+folded BN + ReLU), 3x3/s2 max-pool."""
    x = jnp.transpose(images_nchw, (0, 2, 3, 1)).astype(jnp.bfloat16)
    x = apply_conv(x, stem_p, 7, 7, 2, 3, relu=True)
    return maxpool_3x3_s2_p1(x)


@functools.partial(jax.jit, static_argnames=("stride",))
def bottleneck(x, bp, stride):
    """torchvision Bottleneck: 1x1 -> 3x3(stride) -> 1x1 + identity, ReLU.

    One jit per unique block signature (8 distinct shapes for ResNet-152), so
    the im2col glue and the three fused conv kernels compile into a single XLA
    program per block and runtime dispatch drops to ~51 calls for the whole
    backbone.
    TODO(synk): full VMEM-resident fusion of the three convs (+downsample)
    into one pallas_call is the remaining step; it needs in-kernel spatial
    reshapes for the 3x3 tap loop.
    """
    identity = (apply_conv(x, bp["ds"], 1, 1, stride, 0, relu=False)
                if "ds" in bp else x)
    out = apply_conv(x, bp["conv1"], 1, 1, 1, 0, relu=True)
    out = apply_conv(out, bp["conv2"], 3, 3, stride, 1, relu=True)
    # relu(bn3(conv3(out)) + identity) with the add fused into the epilogue.
    out = apply_conv(out, bp["conv3"], 1, 1, 1, 0, relu=True, residual=identity)
    return out


def resnet_cnn_forward(prepared, images_nchw):
    """ResNetCNN forward: ResNet-152 features -> detach -> 3-layer FC head."""
    x = stem_forward(images_nchw, prepared["stem"])
    for li, (_planes, blocks, stride) in enumerate(LAYER_CFG):
        for b in range(blocks):
            x = bottleneck(x, prepared["layers"][li][b],
                           stride=stride if b == 0 else 1)
    # Variable(features.data) is a detach: forward-value no-op.
    return fc_head(x, prepared["fc"])            # (N, 12)


if __name__ == "__main__":
    key = jax.random.PRNGKey(0)
    pkey, xkey = jax.random.split(key)
    params = init_params(pkey)
    prepared = prepare_params(params)
    images = jax.random.normal(xkey, (2, 3, 32, 32), jnp.float32)  # NCHW like PyTorch
    out = jax.block_until_ready(resnet_cnn_forward(prepared, images))
    assert out.shape == (2, _NUM_CLASSES), out.shape
    assert bool(jnp.all(jnp.isfinite(out)))
    print("KERNEL_OK")
</pallas_src>

<mosaic_0001>
module attributes {stable_mosaic.version = 11 : i64} {
  func.func @_mm_kernel(%arg0: i32, %arg1: i32, %arg2: i32, %arg3: memref<256x147xbf16, #tpu.memory_space<vmem>>, %arg4: memref<147x128xi8, #tpu.memory_space<vmem>>, %arg5: memref<1x128xf32, #tpu.memory_space<vmem>>, %arg6: memref<1x128xf32, #tpu.memory_space<vmem>>, %arg7: memref<256x128xbf16, #tpu.memory_space<vmem>>) attributes {dimension_semantics = [#tpu.dimension_semantics<parallel>, #tpu.dimension_semantics<parallel>, #tpu.dimension_semantics<arbitrary>], iteration_bounds = array<i64: 2, 1, 1>, scalar_prefetch = 0 : i64, scratch_operands = 0 : i64, tpu.core_type = #tpu.core_type<tc>, window_params = [{transform_indices = @transform_0, window_bounds = array<i64: 256, 147>}, {transform_indices = @transform_1, window_bounds = array<i64: 147, 128>}, {transform_indices = @transform_2, window_bounds = array<i64: 1, 128>}, {transform_indices = @transform_3, window_bounds = array<i64: 1, 128>}, {transform_indices = @transform_4, window_bounds = array<i64: 256, 128>}]} {
    %c0 = arith.constant 0 : index
    %c0_0 = arith.constant 0 : index
    %0 = vector.load %arg4[%c0, %c0_0] : memref<147x128xi8, #tpu.memory_space<vmem>>, vector<147x128xi8>
    %1 = arith.sitofp %0 : vector<147x128xi8> to vector<147x128xbf16>
    %c0_1 = arith.constant 0 : index
    %c0_2 = arith.constant 0 : index
    %2 = vector.load %arg3[%c0_1, %c0_2] : memref<256x147xbf16, #tpu.memory_space<vmem>>, vector<256x147xbf16>
    %cst = arith.constant dense<0.000000e+00> : vector<256x128xf32>
    %3 = tpu.matmul %2, %1, %cst {dimension_numbers = #tpu.dot_dimension_numbers<[1], [0], [0], [1], [0, 0, 1, 1], [], []>} : vector<256x147xbf16>, vector<147x128xbf16>, vector<256x128xf32> -> vector<256x128xf32>
    %c0_3 = arith.constant 0 : index
    %c0_4 = arith.constant 0 : index
    %4 = vector.load %arg5[%c0_3, %c0_4] : memref<1x128xf32, #tpu.memory_space<vmem>>, vector<1x128xf32>
    %5 = vector.broadcast %4 : vector<1x128xf32> to vector<256x128xf32>
    %6 = arith.mulf %3, %5 : vector<256x128xf32>
    %c0_5 = arith.constant 0 : index
    %c0_6 = arith.constant 0 : index
    %7 = vector.load %arg6[%c0_5, %c0_6] : memref<1x128xf32, #tpu.memory_space<vmem>>, vector<1x128xf32>
    %8 = vector.broadcast %7 : vector<1x128xf32> to vector<256x128xf32>
    %9 = arith.addf %6, %8 : vector<256x128xf32>
    %cst_7 = arith.constant 0.000000e+00 : f32
    %10 = vector.broadcast %cst_7 : f32 to vector<256x128xf32>
    %11 = arith.maximumf %9, %10 : vector<256x128xf32>
    %12 = arith.truncf %11 : vector<256x128xf32> to vector<256x128xbf16>
    %c0_8 = arith.constant 0 : index
    %c0_9 = arith.constant 0 : index
    %13 = vector.load %arg7[%c0_8, %c0_9] : memref<256x128xbf16, #tpu.memory_space<vmem>>, vector<256x128xbf16>
    tpu.vector_store %arg7[%c0_8, %c0_9], %12 {strides = array<i32>} : memref<256x128xbf16, #tpu.memory_space<vmem>>, vector<256x128xbf16>,
    return
  }
  func.func @transform_0(%arg0: i32, %arg1: i32, %arg2: i32) -> (i32, i32) {
    %c0_i32 = arith.constant 0 : i32
    return %arg0, %arg2 : i32, i32
  }
  func.func @transform_1(%arg0: i32, %arg1: i32, %arg2: i32) -> (i32, i32) {
    %c0_i32 = arith.constant 0 : i32
    return %arg2, %arg1 : i32, i32
  }
  func.func @transform_2(%arg0: i32, %arg1: i32, %arg2: i32) -> (i32, i32) {
    %c0_i32 = arith.constant 0 : i32
    %c0_i32_0 = arith.constant 0 : i32
    return %c0_i32, %arg1 : i32, i32
  }
  func.func @transform_3(%arg0: i32, %arg1: i32, %arg2: i32) -> (i32, i32) {
    %c0_i32 = arith.constant 0 : i32
    %c0_i32_0 = arith.constant 0 : i32
    return %c0_i32, %arg1 : i32, i32
  }
  func.func @transform_4(%arg0: i32, %arg1: i32, %arg2: i32) -> (i32, i32) {
    %c0_i32 = arith.constant 0 : i32
    return %arg0, %arg1 : i32, i32
  }
}

</mosaic_0001>

<bundles_post_ra>
// kernel: stem_forward.1
= control target key start
LH: loop header
LB: loop body
LE: loop exit
PB: predicated region body
PF: predicated region fallthrough
CT: control target
= control target key end

     0   :  { %s1573_s15 = smov 0   ;;  %s1575_s16 = smov 0   ;;  %s1832_s0 = inlined_call_operand.vmem [shape: bf16[512,147], index: 0, kind: input, shape index: {}]   ;;  %s1833_s1 = inlined_call_operand.vmem [shape: s8[147,128], index: 1, kind: input, shape index: {}]   ;;  %s1834_s2 = inlined_call_operand.vmem [shape: f32[1,128], index: 2, kind: input, shape index: {}]   ;;  %s1835_s3 = inlined_call_operand.vmem [shape: f32[1,128], index: 3, kind: input, shape index: {}]   ;;  %s1836_s4 = inlined_call_operand.vmem [shape: bf16[512,128], index: 4, kind: output, shape index: {}]  }
   0x1   :  { %s1577_s17 = smov 0  }
   0x2 LB: > { %s33_s18 = sadd.s32 1, %s1540_s16  ;;  %p1200_p0 = scmp.ge.s32.totalorder %s1544_s17, 1  ;;  %s1544_s17 = sphi %s1577_s17, %s14_s17   ;;  %s1540_s16 = sphi %s1575_s16, %s1838_s16   ;;  %s1536_s15 = sphi %s1573_s15, %s1837_s15  }
   0x3   : > { %p35_p1 = scmp.ge.s32.totalorder %s33_s18, 2  ;;  %p224_p2 = scmp.lt.s32.totalorder %s1544_s17, 3 }
   0x5   : > { %s1840_s18 = smov (%p35_p1, %s33_s18), 0  ;;  %p225_p3 = pnand %p1200_p0, %p224_p2 }
   0x6   : > { %v309_v0 = vld [vmem:[%s1833_s1] sm:$0x3] (!%p225_p3)  ;;  %v310_v1 = vld [vmem:[%s1833_s1 + $0x2] sm:$0x3] (!%p225_p3)  ;;  %v1546_v2 = vmov (!%p225_p3), 0   ;;  %s1201_s9 = sshll.u32 (!%p225_p3), %s1536_s15, 5 }
   0x7   : > { %228 = sbr.rel (%p225_p3) target bundleno = 330 (0x14a), region = 36  ;;  %636 = vmatprep.subr.bf16.mxu0 (!%p225_p3), %v1546_v2  ;;  %1428 = vmatprep.subr.bf16.mxu1 (!%p225_p3), %v1546_v2  ;;  %v328_v3 = vunpack.c.l.s8.bf16 (!%p225_p3), %v309_v0  ;;  %v329_v4 = vunpack.c.l.s8.bf16 (!%p225_p3), %v310_v1  ;;  %v311_v5 = vld [vmem:[%s1833_s1 + $0x4] sm:$0x3] (!%p225_p3)  ;;  %v312_v6 = vld [vmem:[%s1833_s1 + $0x6] sm:$0x3] (!%p225_p3)  ;;  %p274_p4 = scmp.lt.s32.totalorder (!%p225_p3), %s1201_s9, 63 }
   0x8   : > { %v330_v7 = vunpack.c.l.s8.bf16 (!%p225_p3), %v311_v5  ;;  %v331_v8 = vunpack.c.l.s8.bf16 (!%p225_p3), %v312_v6  ;;  %v313_v9 = vld [vmem:[%s1833_s1 + $0x8] sm:$0x3] (!%p225_p3)  ;;  %v314_v10 = vld [vmem:[%s1833_s1 + $0xa] sm:$0x3] (!%p225_p3)  ;;  %v315_v15 = vld [vmem:[%s1833_s1 + $0xc] sm:$0x3] (!%p225_p3) }
   0x9   : > { %v1238_v11 = vcombine.low (!%p225_p3), %v328_v3, %v329_v4  ;;  %v332_v13 = vunpack.c.l.s8.bf16 (!%p225_p3), %v313_v9  ;;  %v333_v14 = vunpack.c.l.s8.bf16 (!%p225_p3), %v314_v10  ;;  %v316_v16 = vld [vmem:[%s1833_s1 + $0xe] sm:$0x3] (!%p225_p3)  ;;  %v334_v18 = vunpack.c.l.s8.bf16 (!%p225_p3), %v315_v15  ;;  %v317_v20 = vld [vmem:[%s1833_s1 + $0x10] sm:$0x3] (!%p225_p3)  ;;  %v318_v21 = vld [vmem:[%s1833_s1 + $0x12] sm:$0x3] (!%p225_p3) }
   0xa   : > { %v1239_v12 = vcombine.low (!%p225_p3), %v330_v7, %v331_v8  ;;  %v335_v19 = vunpack.c.l.s8.bf16 (!%p225_p3), %v316_v16  ;;  %v319_v22 = vld [vmem:[%s1833_s1 + $0x14] sm:$0x3] (!%p225_p3)  ;;  %v336_v24 = vunpack.c.l.s8.bf16 (!%p225_p3), %v317_v20  ;;  %v337_v25 = vunpack.c.l.s8.bf16 (!%p225_p3), %v318_v21  ;;  %v320_v26 = vld [vmem:[%s1833_s1 + $0x16] sm:$0x3] (!%p225_p3)  ;;  %v321_v32 = vld [vmem:[%s1833_s1 + $0x18] sm:$0x3] (!%p225_p3) }
   0xb   : > { %637 = vmatpush1.bf16.msra.mxu0 (!%p225_p3), %v1238_v11  ;;  %1438 = vmatpush1.bf16.msra.mxu1 (!%p225_p3), %v1238_v11  ;;  %v1240_v17 = vcombine.low (!%p225_p3), %v332_v13, %v333_v14  ;;  %vm580_vm0 = vcmask (!%p225_p3), 154624   ;;  %v338_v30 = vunpack.c.l.s8.bf16 (!%p225_p3), %v319_v22  ;;  %v339_v31 = vunpack.c.l.s8.bf16 (!%p225_p3), %v320_v26  ;;  %v322_v33 = vld [vmem:[%s1833_s1 + $0x1a] sm:$0x3] (!%p225_p3)  ;;  %v323_v37 = vld [vmem:[%s1833_s1 + $0x1c] sm:$0x3] (!%p225_p3) }
   0xc   : > { %638 = vmatprep.subr.bf16.mxu0 (!%p225_p3), %v1546_v2  ;;  %1429 = vmatprep.subr.bf16.mxu1 (!%p225_p3), %v1546_v2  ;;  %v1241_v23 = vcombine.low (!%p225_p3), %v334_v18, %v335_v19  ;;  %v1242_v29 = vcombine.low (!%p225_p3), %v336_v24, %v337_v25  ;;  %v340_v35 = vunpack.c.l.s8.bf16 (!%p225_p3), %v321_v32  ;;  %v341_v36 = vunpack.c.l.s8.bf16 (!%p225_p3), %v322_v33  ;;  %v324_v38 = vld [vmem:[%s1833_s1 + $0x1e] sm:$0x3] (!%p225_p3)  ;;  %v325_v42 = vld [vmem:[%s1833_s1 + $0x20] sm:$0x3] (!%p225_p3)  ;;  %v326_v43 = vld [vmem:[%s1833_s1 + $0x22] sm:$0x3] (!%p225_p3) }
   0xd   : > { %v1243_v34 = vcombine.low (!%p225_p3), %v338_v30, %v339_v31  ;;  %v342_v40 = vunpack.c.l.s8.bf16 (!%p225_p3), %v323_v37  ;;  %v343_v41 = vunpack.c.l.s8.bf16 (!%p225_p3), %v324_v38  ;;  %v327_v44 = vld [vmem:[%s1833_s1 + $0x24] sm:$0x1] (!%p225_p3)  ;;  %vm629_vm1 = vcmask (!%p225_p3), 1040384   ;;  %v1730_v21 = vld [vmem:[%s1834_s2] ss:$0 sm:$0xff] (!%p225_p3) }
   0xe   : > { %s1842_s9 = smov (!%p274_p4, %s1201_s9), 63  ;;  %v1244_v39 = vcombine.low %v340_v35, %v341_v36  ;;  %v344_v46 = vunpack.c.l.s8.bf16 %v325_v42  ;;  %v345_v47 = vunpack.c.l.s8.bf16 %v326_v43  ;;  %v346_v48 = vunpack.c.l.s8.bf16 %v327_v44 }
   0xf   : > { %639 = vmatpush1.bf16.msra.mxu0 %v1239_v12  ;;  %1439 = vmatpush1.bf16.msra.mxu1 %v1239_v12  ;;  %s1300_s14 = sshll.u32 %s1842_s9, 3  ;;  %v1245_v45 = vcombine.low %v342_v40, %v343_v41  ;;  %vm630_vm2 = vcmask 1041408   ;;  %v1547_v49 = vmov 65535   ;;  %s1205_s21 = sshll.u32 %s1842_s9, 2 }
  0x10   : > { %640 = vmatprep.subr.bf16.mxu0 %v1546_v2  ;;  %1430 = vmatprep.subr.bf16.mxu1 %v1546_v2  ;;  %s1639_s22 = scalar_lea.vmem %s1832_s0, %s1300_s14  ;;  %v631_v50 = vsel %vm629_vm1, 4294967295, %v1547_v49  ;;  %v1246_v51 = vcombine.low %v344_v46, %v345_v47  ;;  %v1247_v52 = vcombine.low %v346_v48, %v346_v48  ;;  %s1749_s24 = scalar_lea.vmem %s1836_s4, %s1205_s21 }
  0x11   : > { %v1476_v27 = vld [vmem:[%s1639_s22 + $0x4] ss:$8 sps:$4 sm:$0xff]   ;;  %v632_v53 = vsel %vm630_vm2, %v631_v50, 0  ;;  %v1474_v55 = vld [vmem:[%s1639_s22] ss:$8 sps:$4 sm:$0xff]  }
  0x12   : > { %v1479_v28 = vld [vmem:[%s1639_s22 + $0x84] ss:$8 sps:$4 sm:$0xff]   ;;  %1248 = vmatprep.mubr.msk.bf16.mxu0 %vm580_vm0, %v1476_v27  ;;  %v634_v54 = vand.u32 %v1247_v52, %v632_v53  ;;  %v1477_v56 = vld [vmem:[%s1639_s22 + $0x80] ss:$8 sps:$4 sm:$0xff]   ;;  %v1480_v57 = vld [vmem:[%s1639_s22 + $0x14] ss:$8 sps:$4 sm:$0xff]  }
  0x13   : > { %641 = vmatpush1.bf16.msra.mxu0 %v1240_v17  ;;  %1440 = vmatpush1.bf16.msra.mxu1 %v1240_v17  ;;  %v1482_v58 = vld [vmem:[%s1639_s22 + $0x94] ss:$8 sps:$4 sm:$0xff]   ;;  %v1484_v59 = vld [vmem:[%s1639_s22 + $0x10] ss:$8 sps:$4 sm:$0xff]   ;;  %v1486_v61 = vld [vmem:[%s1639_s22 + $0x24] ss:$8 sps:$4 sm:$0xff]  }
  0x14   : > { %642 = vmatprep.subr.bf16.mxu0 %v1546_v2  ;;  %1431 = vmatprep.subr.bf16.mxu1 %v1546_v2  ;;  %v1485_v60 = vld [vmem:[%s1639_s22 + $0x90] ss:$8 sps:$4 sm:$0xff]   ;;  %v1488_v62 = vld [vmem:[%s1639_s22 + $0xa4] ss:$8 sps:$4 sm:$0xff]   ;;  %v1490_v63 = vld [vmem:[%s1639_s22 + $0x20] ss:$8 sps:$4 sm:$0xff]  }
  0x15   : > { %1256 = vmatprep.mubr.msk.bf16.mxu1 %vm580_vm0, %v1479_v28  ;;  %v1491_v0 = vld [vmem:[%s1639_s22 + $0xa0] ss:$8 sps:$4 sm:$0xff]   ;;  %v1492_v1 = vld [vmem:[%s1639_s22 + $0x34] ss:$8 sps:$4 sm:$0xff]   ;;  %v1496_v3 = vld [vmem:[%s1639_s22 + $0x30] ss:$8 sps:$4 sm:$0xff]  }
  0x16   : > { %v1497_v4 = vld [vmem:[%s1639_s22 + $0xb0] ss:$8 sps:$4 sm:$0xff]   ;;  %v1498_v5 = vld [vmem:[%s1639_s22 + $0x44] ss:$8 sps:$4 sm:$0xff]   ;;  %v1502_v7 = vld [vmem:[%s1639_s22 + $0x40] ss:$8 sps:$4 sm:$0xff]  }
  0x17   : > { %643 = vmatpush1.bf16.msra.mxu0 %v1241_v23  ;;  %1441 = vmatpush1.bf16.msra.mxu1 %v1241_v23  ;;  %v1500_v6 = vld [vmem:[%s1639_s22 + $0xc4] ss:$8 sps:$4 sm:$0xff]   ;;  %v1503_v8 = vld [vmem:[%s1639_s22 + $0xc0] ss:$8 sps:$4 sm:$0xff]   ;;  %v1504_v9 = vld [vmem:[%s1639_s22 + $0x54] ss:$8 sps:$4 sm:$0xff]  }
  0x18   : > { %644 = vmatprep.subr.bf16.mxu0 %v1546_v2  ;;  %1432 = vmatprep.subr.bf16.mxu1 %v1546_v2  ;;  %v1506_v10 = vld [vmem:[%s1639_s22 + $0xd4] ss:$8 sps:$4 sm:$0xff]   ;;  %v1508_v11 = vld [vmem:[%s1639_s22 + $0x50] ss:$8 sps:$4 sm:$0xff]   ;;  %v1510_v13 = vld [vmem:[%s1639_s22 + $0x64] ss:$8 sps:$4 sm:$0xff]  }
  0x19   : > { %v1509_v12 = vld [vmem:[%s1639_s22 + $0xd0] ss:$8 sps:$4 sm:$0xff]   ;;  %v1512_v14 = vld [vmem:[%s1639_s22 + $0xe4] ss:$8 sps:$4 sm:$0xff]   ;;  %v1514_v15 = vld [vmem:[%s1639_s22 + $0x60] ss:$8 sps:$4 sm:$0xff]  }
  0x1a   : > { %v1515_v16 = vld [vmem:[%s1639_s22 + $0xe0] ss:$8 sps:$4 sm:$0xff]   ;;  %v1516_v17 = vld [vmem:[%s1639_s22 + $0x74] ss:$8 sps:$4 sm:$0xff]   ;;  %v1520_v19 = vld [vmem:[%s1639_s22 + $0x70] ss:$8 sps:$4 sm:$0xff]  }
  0x1b   : > { %645 = vmatpush1.bf16.msra.mxu0 %v1242_v29  ;;  %1442 = vmatpush1.bf16.msra.mxu1 %v1242_v29  ;;  %v1518_v18 = vld [vmem:[%s1639_s22 + $0xf4] ss:$8 sps:$4 sm:$0xff]   ;;  %v1521_v20 = vld [vmem:[%s1639_s22 + $0xf0] ss:$8 sps:$4 sm:$0xff]   ;;  %v1735_v23 = vld [vmem:[%s1835_s3] ss:$0 sm:$0xff] }
  0x1c   : > { %646 = vmatprep.subr.bf16.mxu0 %v1546_v2  ;;  %1433 = vmatprep.subr.bf16.mxu1 %v1546_v2 }
  0x1f   : > { %647 = vmatpush1.bf16.msra.mxu0 %v1243_v34  ;;  %1443 = vmatpush1.bf16.msra.mxu1 %v1243_v34 }
  0x20   : > { %648 = vmatprep.subr.bf16.mxu0 %v1546_v2  ;;  %1434 = vmatprep.subr.bf16.mxu1 %v1546_v2 }
  0x23   : > { %649 = vmatpush1.bf16.msra.mxu0 %v1244_v39  ;;  %1444 = vmatpush1.bf16.msra.mxu1 %v1244_v39 }
  0x24   : > { %650 = vmatprep.subr.bf16.mxu0 %v1546_v2  ;;  %1435 = vmatprep.subr.bf16.mxu1 %v1546_v2 }
  0x27   : > { %651 = vmatpush1.bf16.msra.mxu0 %v1245_v45  ;;  %1445 = vmatpush1.bf16.msra.mxu1 %v1245_v45 }
  0x28   : > { %652 = vmatprep.subr.bf16.mxu0 %v1546_v2  ;;  %1436 = vmatprep.subr.bf16.mxu1 %v1546_v2 }
  0x2b   : > { %653 = vmatpush1.bf16.msra.mxu0 %v1246_v51  ;;  %1446 = vmatpush1.bf16.msra.mxu1 %v1246_v51 }
  0x2c   : > { %654 = vmatprep.subr.bf16.mxu0 %v1546_v2  ;;  %1437 = vmatprep.subr.bf16.mxu1 %v1546_v2  ;;  %v1494_v2 = vld [vmem:[%s1639_s22 + $0xb4] ss:$8 sps:$4 sm:$0xff]  }
  0x2f   : > { %655 = vmatpush1.bf16.msra.mxu0 %v634_v54  ;;  %1447 = vmatpush1.bf16.msra.mxu1 %v634_v54 }
  0x32   : > { %669 = vmatmul.mubr.bf16.vlgmr.msra.gmra.mrb[0].mxu0 %v1474_v55  ;;  %733 = vmatmul.mubr.bf16.vlgmr.msra.gmra.mrb[0].mxu1 %v1477_v56 }
  0x33   : > { %1249 = vmatprep.mubr.msk.bf16.mxu0 %vm580_vm0, %v1480_v57  ;;  %1257 = vmatprep.mubr.msk.bf16.mxu1 %vm580_vm0, %v1482_v58 }
  0x3a   : > { %677 = vmatmul.mubr.bf16.gmra.mrb[4].mxu0 %v1484_v59  ;;  %741 = vmatmul.mubr.bf16.gmra.mrb[4].mxu1 %v1485_v60 }
  0x3b   : > { %1250 = vmatprep.mubr.msk.bf16.mxu0 %vm580_vm0, %v1486_v61  ;;  %1258 = vmatprep.mubr.msk.bf16.mxu1 %vm580_vm0, %v1488_v62 }
  0x42   : > { %685 = vmatmul.mubr.bf16.gmra.mrb[8].mxu0 %v1490_v63  ;;  %749 = vmatmul.mubr.bf16.gmra.mrb[8].mxu1 %v1491_v0 }
  0x43   : > { %1251 = vmatprep.mubr.msk.bf16.mxu0 %vm580_vm0, %v1492_v1  ;;  %1259 = vmatprep.mubr.msk.bf16.mxu1 %vm580_vm0, %v1494_v2 }
  0x4a   : > { %693 = vmatmul.mubr.bf16.gmra.mrb[12].mxu0 %v1496_v3  ;;  %757 = vmatmul.mubr.bf16.gmra.mrb[12].mxu1 %v1497_v4 }
  0x4b   : > { %1252 = vmatprep.mubr.msk.bf16.mxu0 %vm580_vm0, %v1498_v5  ;;  %1260 = vmatprep.mubr.msk.bf16.mxu1 %vm580_vm0, %v1500_v6 }
  0x52   : > { %701 = vmatmul.mubr.bf16.gmra.mrb[16].mxu0 %v1502_v7  ;;  %765 = vmatmul.mubr.bf16.gmra.mrb[16].mxu1 %v1503_v8 }
  0x53   : > { %1253 = vmatprep.mubr.msk.bf16.mxu0 %vm580_vm0, %v1504_v9  ;;  %1261 = vmatprep.mubr.msk.bf16.mxu1 %vm580_vm0, %v1506_v10 }
  0x5a   : > { %709 = vmatmul.mubr.bf16.gmra.mrb[20].mxu0 %v1508_v11  ;;  %773 = vmatmul.mubr.bf16.gmra.mrb[20].mxu1 %v1509_v12 }
  0x5b   : > { %1254 = vmatprep.mubr.msk.bf16.mxu0 %vm580_vm0, %v1510_v13  ;;  %1262 = vmatprep.mubr.msk.bf16.mxu1 %vm580_vm0, %v1512_v14 }
  0x62   : > { %717 = vmatmul.mubr.bf16.gmra.mrb[24].mxu0 %v1514_v15  ;;  %781 = vmatmul.mubr.bf16.gmra.mrb[24].mxu1 %v1515_v16 }
  0x63   : > { %1255 = vmatprep.mubr.msk.bf16.mxu0 %vm580_vm0, %v1516_v17  ;;  %1263 = vmatprep.mubr.msk.bf16.mxu1 %vm580_vm0, %v1518_v18 }
  0x6a   : > { %725 = vmatmul.mubr.bf16.gmra.mrb[28].mxu0 %v1520_v19  ;;  %789 = vmatmul.mubr.bf16.gmra.mrb[28].mxu1 %v1521_v20 }
 0x105   : > { %v670_v22 = vpop.f32.mrb[0].mxu0  ;;  %v734_v24 = vpop.f32.mrb[0].mxu1 }
 0x106   : > { %v804_v25 = vmul.f32 %v1730_v21, %v670_v22  ;;  %v820_v26 = vmul.f32 %v1730_v21, %v734_v24  ;;  %v672_v27 = vpop.f32.mrb[1].mxu0  ;;  %v736_v28 = vpop.f32.mrb[1].mxu1 }
 0x107   : > { %v673_v29 = vpop.f32.mrb[2].mxu0  ;;  %v737_v30 = vpop.f32.mrb[2].mxu1 }
 0x108   : > { %v843_v31 = vadd.f32 %v1735_v23, %v804_v25  ;;  %v859_v32 = vadd.f32 %v1735_v23, %v820_v26  ;;  %v805_v33 = vmul.f32 %v1730_v21, %v673_v29  ;;  %v821_v34 = vmul.f32 %v1730_v21, %v737_v30  ;;  %v675_v35 = vpop.f32.mrb[3].mxu0  ;;  %v739_v36 = vpop.f32.mrb[3].mxu1 }
 0x10a   : > { %v844_v37 = vadd.f32 %v1735_v23, %v805_v33  ;;  %v860_v38 = vadd.f32 %v1735_v23, %v821_v34  ;;  %v875_v39 = vmax.f32 %v843_v31, 0.0  ;;  %v891_v40 = vmax.f32 %v859_v32, 0.0 }
 0x10c   : > { %v876_v41 = vmax.f32 %v844_v37, 0.0  ;;  %v892_v42 = vmax.f32 %v860_v38, 0.0 }
 0x10d   : > { %v678_v43 = vpop.f32.mrb[4].mxu0  ;;  %v742_v44 = vpop.f32.mrb[4].mxu1 }
 0x10e   : > { %v1336_v45 = vpack.c.bf16 %v876_v41, %v875_v39  ;;  %v1376_v46 = vpack.c.bf16 %v892_v42, %v891_v40  ;;  %v806_v47 = vmul.f32 %v1730_v21, %v678_v43  ;;  %v822_v48 = vmul.f32 %v1730_v21, %v742_v44  ;;  %v680_v49 = vpop.f32.mrb[5].mxu0  ;;  %v744_v50 = vpop.f32.mrb[5].mxu1 }
 0x10f   : > { %v681_v51 = vpop.f32.mrb[6].mxu0  ;;  %v745_v52 = vpop.f32.mrb[6].mxu1 }
 0x110   : > { %1337 = vst [vmem:[%s1749_s24] sm:$0xff] %v1336_v45   ;;  %1420 = vst [vmem:[%s1749_s24 + $0x40] sm:$0xff] %v1376_v46   ;;  %v845_v53 = vadd.f32 %v1735_v23, %v806_v47  ;;  %v861_v54 = vadd.f32 %v1735_v23, %v822_v48  ;;  %v807_v55 = vmul.f32 %v1730_v21, %v681_v51  ;;  %v683_v57 = vpop.f32.mrb[7].mxu0  ;;  %v747_v58 = vpop.f32.mrb[7].mxu1 }
 0x111   : > { %v823_v56 = vmul.f32 %v1730_v21, %v745_v52 }
 0x112   : > { %v846_v59 = vadd.f32 %v1735_v23, %v807_v55  ;;  %v877_v61 = vmax.f32 %v845_v53, 0.0  ;;  %v893_v62 = vmax.f32 %v861_v54, 0.0 }
 0x113   : > { %v862_v60 = vadd.f32 %v1735_v23, %v823_v56 }
 0x114   : > { %v878_v63 = vmax.f32 %v846_v59, 0.0 }
 0x115   : > { %v894_v0 = vmax.f32 %v862_v60, 0.0  ;;  %v686_v1 = vpop.f32.mrb[8].mxu0  ;;  %v750_v2 = vpop.f32.mrb[8].mxu1 }
 0x116   : > { %v1341_v3 = vpack.c.bf16 %v878_v63, %v877_v61  ;;  %v808_v5 = vmul.f32 %v1730_v21, %v686_v1  ;;  %v824_v6 = vmul.f32 %v1730_v21, %v750_v2  ;;  %v688_v7 = vpop.f32.mrb[9].mxu0  ;;  %v752_v8 = vpop.f32.mrb[9].mxu1 }
 0x117   : > { %v1381_v4 = vpack.c.bf16 %v894_v0, %v893_v62  ;;  %v689_v9 = vpop.f32.mrb[10].mxu0  ;;  %v753_v10 = vpop.f32.mrb[10].mxu1 }
 0x118   : > { %1413 = vst [vmem:[%s1749_s24 + $0x8] sm:$0xff] %v1341_v3   ;;  %v847_v11 = vadd.f32 %v1735_v23, %v808_v5  ;;  %v863_v12 = vadd.f32 %v1735_v23, %v824_v6  ;;  %v809_v13 = vmul.f32 %v1730_v21, %v689_v9  ;;  %v825_v14 = vmul.f32 %v1730_v21, %v753_v10  ;;  %v691_v15 = vpop.f32.mrb[11].mxu0  ;;  %v755_v16 = vpop.f32.mrb[11].mxu1 }
 0x119   : > { %1421 = vst [vmem:[%s1749_s24 + $0x48] sm:$0xff] %v1381_v4  }
 0x11a   : > { %v848_v17 = vadd.f32 %v1735_v23, %v809_v13  ;;  %v864_v18 = vadd.f32 %v1735_v23, %v825_v14  ;;  %v879_v19 = vmax.f32 %v847_v11, 0.0  ;;  %v895_v20 = vmax.f32 %v863_v12, 0.0 }
 0x11c   : > { %v880_v22 = vmax.f32 %v848_v17, 0.0  ;;  %v896_v24 = vmax.f32 %v864_v18, 0.0 }
 0x11d   : > { %v694_v25 = vpop.f32.mrb[12].mxu0  ;;  %v758_v26 = vpop.f32.mrb[12].mxu1 }
 0x11e   : > { %v1346_v27 = vpack.c.bf16 %v880_v22, %v879_v19  ;;  %v1386_v28 = vpack.c.bf16 %v896_v24, %v895_v20  ;;  %v810_v29 = vmul.f32 %v1730_v21, %v694_v25  ;;  %v826_v30 = vmul.f32 %v1730_v21, %v758_v26  ;;  %v696_v31 = vpop.f32.mrb[13].mxu0  ;;  %v760_v32 = vpop.f32.mrb[13].mxu1 }
 0x11f   : > { %v697_v33 = vpop.f32.mrb[14].mxu0  ;;  %v761_v34 = vpop.f32.mrb[14].mxu1 }
 0x120   : > { %1414 = vst [vmem:[%s1749_s24 + $0x10] sm:$0xff] %v1346_v27   ;;  %1422 = vst [vmem:[%s1749_s24 + $0x50] sm:$0xff] %v1386_v28   ;;  %v849_v35 = vadd.f32 %v1735_v23, %v810_v29  ;;  %v865_v36 = vadd.f32 %v1735_v23, %v826_v30  ;;  %v811_v37 = vmul.f32 %v1730_v21, %v697_v33  ;;  %v699_v39 = vpop.f32.mrb[15].mxu0  ;;  %v763_v40 = vpop.f32.mrb[15].mxu1 }
 0x121   : > { %v827_v38 = vmul.f32 %v1730_v21, %v761_v34 }
 0x122   : > { %v850_v41 = vadd.f32 %v1735_v23, %v811_v37  ;;  %v881_v43 = vmax.f32 %v849_v35, 0.0  ;;  %v897_v44 = vmax.f32 %v865_v36, 0.0 }
 0x123   : > { %v866_v42 = vadd.f32 %v1735_v23, %v827_v38 }
 0x124   : > { %v882_v45 = vmax.f32 %v850_v41, 0.0 }
 0x125   : > { %v898_v46 = vmax.f32 %v866_v42, 0.0  ;;  %v702_v47 = vpop.f32.mrb[16].mxu0  ;;  %v766_v48 = vpop.f32.mrb[16].mxu1 }
 0x126   : > { %v1351_v49 = vpack.c.bf16 %v882_v45, %v881_v43  ;;  %v812_v51 = vmul.f32 %v1730_v21, %v702_v47  ;;  %v828_v52 = vmul.f32 %v1730_v21, %v766_v48  ;;  %v704_v53 = vpop.f32.mrb[17].mxu0  ;;  %v768_v54 = vpop.f32.mrb[17].mxu1 }
 0x127   : > { %v1391_v50 = vpack.c.bf16 %v898_v46, %v897_v44  ;;  %v705_v55 = vpop.f32.mrb[18].mxu0  ;;  %v769_v56 = vpop.f32.mrb[18].mxu1 }
 0x128   : > { %1415 = vst [vmem:[%s1749_s24 + $0x18] sm:$0xff] %v1351_v49   ;;  %v851_v57 = vadd.f32 %v1735_v23, %v812_v51  ;;  %v867_v58 = vadd.f32 %v1735_v23, %v828_v52  ;;  %v813_v59 = vmul.f32 %v1730_v21, %v705_v55  ;;  %v829_v60 = vmul.f32 %v1730_v21, %v769_v56  ;;  %v707_v61 = vpop.f32.mrb[19].mxu0  ;;  %v771_v62 = vpop.f32.mrb[19].mxu1 }
 0x129   : > { %1423 = vst [vmem:[%s1749_s24 + $0x58] sm:$0xff] %v1391_v50  }
 0x12a   : > { %v852_v63 = vadd.f32 %v1735_v23, %v813_v59  ;;  %v868_v0 = vadd.f32 %v1735_v23, %v829_v60  ;;  %v883_v1 = vmax.f32 %v851_v57, 0.0  ;;  %v899_v2 = vmax.f32 %v867_v58, 0.0 }
 0x12c   : > { %v884_v3 = vmax.f32 %v852_v63, 0.0  ;;  %v900_v4 = vmax.f32 %v868_v0, 0.0 }
 0x12d   : > { %v710_v5 = vpop.f32.mrb[20].mxu0  ;;  %v774_v6 = vpop.f32.mrb[20].mxu1 }
 0x12e   : > { %v1356_v7 = vpack.c.bf16 %v884_v3, %v883_v1  ;;  %v1396_v8 = vpack.c.bf16 %v900_v4, %v899_v2  ;;  %v814_v9 = vmul.f32 %v1730_v21, %v710_v5  ;;  %v830_v10 = vmul.f32 %v1730_v21, %v774_v6  ;;  %v712_v11 = vpop.f32.mrb[21].mxu0  ;;  %v776_v12 = vpop.f32.mrb[21].mxu1 }
 0x12f   : > { %v713_v13 = vpop.f32.mrb[22].mxu0  ;;  %v777_v14 = vpop.f32.mrb[22].mxu1 }
 0x130   : > { %1416 = vst [vmem:[%s1749_s24 + $0x20] sm:$0xff] %v1356_v7   ;;  %1424 = vst [vmem:[%s1749_s24 + $0x60] sm:$0xff] %v1396_v8   ;;  %v853_v15 = vadd.f32 %v1735_v23, %v814_v9  ;;  %v869_v16 = vadd.f32 %v1735_v23, %v830_v10  ;;  %v815_v17 = vmul.f32 %v1730_v21, %v713_v13  ;;  %v715_v19 = vpop.f32.mrb[23].mxu0  ;;  %v779_v20 = vpop.f32.mrb[23].mxu1 }
 0x131   : > { %v831_v18 = vmul.f32 %v1730_v21, %v777_v14 }
 0x132   : > { %v854_v22 = vadd.f32 %v1735_v23, %v815_v17  ;;  %v885_v25 = vmax.f32 %v853_v15, 0.0  ;;  %v901_v26 = vmax.f32 %v869_v16, 0.0 }
 0x133   : > { %v870_v24 = vadd.f32 %v1735_v23, %v831_v18 }
 0x134   : > { %v886_v27 = vmax.f32 %v854_v22, 0.0 }
 0x135   : > { %v902_v28 = vmax.f32 %v870_v24, 0.0  ;;  %v718_v29 = vpop.f32.mrb[24].mxu0  ;;  %v782_v30 = vpop.f32.mrb[24].mxu1 }
 0x136   : > { %v1361_v31 = vpack.c.bf16 %v886_v27, %v885_v25  ;;  %v816_v33 = vmul.f32 %v1730_v21, %v718_v29  ;;  %v832_v34 = vmul.f32 %v1730_v21, %v782_v30  ;;  %v720_v35 = vpop.f32.mrb[25].mxu0  ;;  %v784_v36 = vpop.f32.mrb[25].mxu1 }
 0x137   : > { %v1401_v32 = vpack.c.bf16 %v902_v28, %v901_v26  ;;  %v721_v37 = vpop.f32.mrb[26].mxu0  ;;  %v785_v38 = vpop.f32.mrb[26].mxu1 }
 0x138   : > { %1417 = vst [vmem:[%s1749_s24 + $0x28] sm:$0xff] %v1361_v31   ;;  %v855_v39 = vadd.f32 %v1735_v23, %v816_v33  ;;  %v871_v40 = vadd.f32 %v1735_v23, %v832_v34  ;;  %v817_v41 = vmul.f32 %v1730_v21, %v721_v37  ;;  %v833_v42 = vmul.f32 %v1730_v21, %v785_v38  ;;  %v723_v43 = vpop.f32.mrb[27].mxu0  ;;  %v787_v44 = vpop.f32.mrb[27].mxu1 }
 0x139   : > { %1425 = vst [vmem:[%s1749_s24 + $0x68] sm:$0xff] %v1401_v32  }
 0x13a   : > { %v856_v45 = vadd.f32 %v1735_v23, %v817_v41  ;;  %v872_v46 = vadd.f32 %v1735_v23, %v833_v42  ;;  %v887_v47 = vmax.f32 %v855_v39, 0.0  ;;  %v903_v48 = vmax.f32 %v871_v40, 0.0 }
 0x13c   : > { %v888_v49 = vmax.f32 %v856_v45, 0.0  ;;  %v904_v50 = vmax.f32 %v872_v46, 0.0 }
 0x13d   : > { %v726_v51 = vpop.f32.mrb[28].mxu0  ;;  %v790_v52 = vpop.f32.mrb[28].mxu1 }
 0x13e   : > { %v1366_v53 = vpack.c.bf16 %v888_v49, %v887_v47  ;;  %v1406_v54 = vpack.c.bf16 %v904_v50, %v903_v48  ;;  %v818_v55 = vmul.f32 %v1730_v21, %v726_v51  ;;  %v834_v56 = vmul.f32 %v1730_v21, %v790_v52  ;;  %v728_v57 = vpop.f32.mrb[29].mxu0  ;;  %v792_v58 = vpop.f32.mrb[29].mxu1 }
 0x13f   : > { %v729_v59 = vpop.f32.mrb[30].mxu0  ;;  %v793_v60 = vpop.f32.mrb[30].mxu1 }
 0x140   : > { %1418 = vst [vmem:[%s1749_s24 + $0x30] sm:$0xff] %v1366_v53   ;;  %1426 = vst [vmem:[%s1749_s24 + $0x70] sm:$0xff] %v1406_v54   ;;  %v857_v61 = vadd.f32 %v1735_v23, %v818_v55  ;;  %v873_v62 = vadd.f32 %v1735_v23, %v834_v56  ;;  %v819_v63 = vmul.f32 %v1730_v21, %v729_v59  ;;  %v731_v1 = vpop.f32.mrb[31].mxu0  ;;  %v795_v2 = vpop.f32.mrb[31].mxu1 }
 0x141   : > { %v835_v0 = vmul.f32 %v1730_v21, %v793_v60 }
 0x142   : > { %v858_v3 = vadd.f32 %v1735_v23, %v819_v63  ;;  %v889_v5 = vmax.f32 %v857_v61, 0.0  ;;  %v905_v6 = vmax.f32 %v873_v62, 0.0 }
 0x143   : > { %v874_v4 = vadd.f32 %v1735_v23, %v835_v0 }
 0x144   : > { %v890_v7 = vmax.f32 %v858_v3, 0.0 }
 0x145   : > { %v906_v8 = vmax.f32 %v874_v4, 0.0 }
 0x146   : > { %v1371_v9 = vpack.c.bf16 %v890_v7, %v889_v5 }
 0x147   : > { %v1411_v10 = vpack.c.bf16 %v906_v8, %v905_v6 }
 0x148   : > { %1419 = vst [vmem:[%s1749_s24 + $0x38] sm:$0xff] %v1371_v9  }
 0x149   : > { %1427 = vst [vmem:[%s1749_s24 + $0x78] sm:$0xff] %v1411_v10  }
 0x14a PF: > { %s14_s17 = sadd.s32 1, %s1544_s17   ;;  %s1837_s15 = smov %s1540_s16 }
 0x14b   : > { %p11_p5 = scmp.ge.s32.totalorder %s14_s17, 4   ;;  %s1838_s16 = smov %s1840_s18 }
 0x14d   :  { %13 = sbr.rel (!%p11_p5) target bundleno = 2 (0x2), region = 75 }

</bundles_post_ra>
